<compile_context>
chip_gen: v6e
topology: v6e:2x2x1
jax: 0.10.0
libtpu: 0.0.40
codegen_flags: <defaults>
</compile_context>

<pallas_src>
import functools

import jax
import jax.numpy as jnp
from jax import lax
from jax.experimental import pallas as pl
from jax.experimental.pallas import tpu as pltpu


def _round_up(x, m):
    return ((x + m - 1) // m) * m


def _ib_loss_kernel(logits_ref, target_ref, feat_ref, out_ref, *,
                    alpha, eps, n_valid, tile_cols, cols_total):
    """One grid step: partial sum of ce*ib over an (8, tile_cols) sample block."""
    i = pl.program_id(0)

    x = logits_ref[...].astype(jnp.float32)      # (C, 8, TC)
    tgt = target_ref[...]                        # (8, TC) int32
    feat = feat_ref[...].astype(jnp.float32)     # (8, TC)
    num_classes = x.shape[0]

    # Numerically stable softmax pieces.  Class axis is the untiled leading
    # axis, so these reductions are plain vreg-vreg VPU ops (no XLU).
    m = jnp.max(x, axis=0)                       # (8, TC)
    z = jnp.zeros_like(m)
    picked = jnp.zeros_like(m)
    e_t = jnp.zeros_like(m)
    for cls in range(num_classes):               # unrolled, C == 10
        ec = jnp.exp(x[cls] - m)                 # EUP
        z = z + ec
        sel = tgt == cls
        picked = jnp.where(sel, x[cls], picked)  # logit of the target class
        e_t = jnp.where(sel, ec, e_t)            # exp(logit_t - m); no second exp

    ce = jnp.log(z) + m - picked                 # per-sample cross entropy
    p_t = e_t / z                                # exact divide (tolerance-critical)
    grads = 2.0 * (1.0 - p_t)                    # == sum_c |softmax - onehot|, exact
    w = ce * (alpha / (grads * feat + eps))      # (8, TC)

    def _emit(vals):
        part = jnp.sum(vals, axis=1, keepdims=True)   # (8, 1)   cross-lane
        part = jnp.sum(part, axis=0, keepdims=True)   # (1, 1)   cross-sublane
        out_ref[...] = part.reshape(1, 1, 1)

    # Fast path for full tiles; only tiles touching padded samples mask.
    needs_mask = (7 * cols_total + (i + 1) * tile_cols) > n_valid

    @pl.when(needs_mask)
    def _masked():
        row = lax.broadcasted_iota(jnp.int32, (8, tile_cols), 0)
        col = lax.broadcasted_iota(jnp.int32, (8, tile_cols), 1) + i * tile_cols
        valid = row * cols_total + col < n_valid
        _emit(jnp.where(valid, w, 0.0))

    @pl.when(jnp.logical_not(needs_mask))
    def _full():
        _emit(w)


@functools.partial(jax.jit, static_argnames=("alpha", "eps", "tile_n"))
def ib_loss_pallas(logits, target, features, *, alpha=10000.0, eps=1e-3,
                   tile_n=131072):
    """logits: (N, C) float, target: (N,) int, features: (N,) or (N, 1) float."""
    n, c = logits.shape

    # Fold samples to (8 sublanes, cols); clamp the tile so padding waste stays
    # small for moderate N while defaulting to ~131K samples (~6 MiB HBM) per step.
    cols_needed = pl.cdiv(n, 8)
    desired_cols = max(128, (int(tile_n) // 8 // 128) * 128)
    grid = max(1, pl.cdiv(cols_needed, desired_cols))
    tile_cols = min(desired_cols, _round_up(pl.cdiv(cols_needed, grid), 128))
    cols_total = grid * tile_cols
    n_pad = 8 * cols_total
    pad = n_pad - n

    # Lane/sublane-dense relayout: classes lead, samples fill (8, cols) vregs.
    # TODO(synk): fuse this transpose into the logits producer to avoid the
    # extra HBM pass; kept adjacent so XLA fuses pad+reshape into the copy.
    logits_f = jnp.pad(logits.T, ((0, 0), (0, pad))).reshape(c, 8, cols_total)
    target_f = jnp.pad(target.reshape(-1).astype(jnp.int32), (0, pad)).reshape(8, cols_total)
    feat_f = jnp.pad(features.reshape(-1), (0, pad)).reshape(8, cols_total)

    kernel = functools.partial(
        _ib_loss_kernel, alpha=float(alpha), eps=float(eps), n_valid=n,
        tile_cols=tile_cols, cols_total=cols_total)

    partials = pl.pallas_call(
        kernel,
        out_shape=jax.ShapeDtypeStruct((grid, 1, 1), jnp.float32),
        grid_spec=pltpu.PrefetchScalarGridSpec(
            num_scalar_prefetch=0,
            grid=(grid,),
            in_specs=[
                pl.BlockSpec((c, 8, tile_cols), lambda i: (0, 0, i)),
                pl.BlockSpec((8, tile_cols), lambda i: (0, i)),
                pl.BlockSpec((8, tile_cols), lambda i: (0, i)),
            ],
            out_specs=pl.BlockSpec((1, 1, 1), lambda i: (i, 0, 0)),
        ),
        compiler_params=pltpu.CompilerParams(
            dimension_semantics=("parallel",),       # v7x: split across both TCs
            vmem_limit_bytes=48 * 1024 * 1024,
        ),
    )(logits_f, target_f, feat_f)

    # Per-tile partials summed here: bounds f32 error and keeps the grid axis
    # parallel (no resident accumulator).
    return jnp.sum(partials) / jnp.float32(n)


def ib_loss_ref(logits, target, features, *, alpha=10000.0, eps=1e-3):
    """Pure-JAX reference mirroring the PyTorch module."""
    num_classes = logits.shape[1]
    sm = jax.nn.softmax(logits, axis=1)
    onehot = jax.nn.one_hot(target, num_classes, dtype=logits.dtype)
    grads = jnp.sum(jnp.abs(sm - onehot), axis=1)
    ib = grads * features.reshape(-1)
    ib = alpha / (ib + eps)
    logz = jax.nn.logsumexp(logits, axis=1)
    ce = logz - jnp.take_along_axis(logits, target[:, None], axis=1)[:, 0]
    return jnp.mean(ce * ib)


if __name__ == "__main__":
    # IBLoss asserts num_classes == 11, then internally uses num_classes = 10.
    N, C = 8, 10

    key = jax.random.PRNGKey(0)
    k1, k2, k3 = jax.random.split(key, 3)
    logits = jax.random.normal(k1, (N, C), dtype=jnp.float32)
    target = jax.random.randint(k2, (N,), 0, C, dtype=jnp.int32)
    features = jax.random.uniform(k3, (N, 1), dtype=jnp.float32, minval=0.1, maxval=2.0)

    loss = ib_loss_pallas(logits, target, features)
    jax.block_until_ready(loss)
    ref = ib_loss_ref(logits, target, features)
    assert jnp.allclose(loss, ref, rtol=1e-4, atol=1e-4), (loss, ref)

    # Multi-tile path: grid of 3 with full-tile fast path + masked last tile.
    N2 = 3000
    k4, k5, k6 = jax.random.split(jax.random.PRNGKey(1), 3)
    logits2 = jax.random.normal(k4, (N2, C), dtype=jnp.float32)
    target2 = jax.random.randint(k5, (N2,), 0, C, dtype=jnp.int32)
    features2 = jax.random.uniform(k6, (N2,), dtype=jnp.float32, minval=0.1, maxval=2.0)
    loss2 = ib_loss_pallas(logits2, target2, features2, tile_n=1024)
    jax.block_until_ready(loss2)
    ref2 = ib_loss_ref(logits2, target2, features2)
    assert jnp.allclose(loss2, ref2, rtol=1e-4, atol=1e-4), (loss2, ref2)

    print("KERNEL_OK")
</pallas_src>

<mosaic_0001>
module attributes {stable_mosaic.version = 11 : i64} {
  func.func @_ib_loss_kernel(%arg0: i32, %arg1: memref<10x8x128xf32, #tpu.memory_space<vmem>>, %arg2: memref<8x128xi32, #tpu.memory_space<vmem>>, %arg3: memref<8x128xf32, #tpu.memory_space<vmem>>, %arg4: memref<1x1x1xf32, #tpu.memory_space<vmem>>) attributes {dimension_semantics = [#tpu.dimension_semantics<parallel>], iteration_bounds = array<i64: 1>, scalar_prefetch = 0 : i64, scratch_operands = 0 : i64, tpu.core_type = #tpu.core_type<tc>, window_params = [{transform_indices = @transform_0, window_bounds = array<i64: 10, 8, 128>}, {transform_indices = @transform_1, window_bounds = array<i64: 8, 128>}, {transform_indices = @transform_2, window_bounds = array<i64: 8, 128>}, {transform_indices = @transform_3, window_bounds = array<i64: 1, 1, 1>}]} {
    %c0 = arith.constant 0 : index
    %c0_0 = arith.constant 0 : index
    %c0_1 = arith.constant 0 : index
    %0 = vector.load %arg1[%c0, %c0_0, %c0_1] : memref<10x8x128xf32, #tpu.memory_space<vmem>>, vector<10x8x128xf32>
    %c0_2 = arith.constant 0 : index
    %c0_3 = arith.constant 0 : index
    %1 = vector.load %arg2[%c0_2, %c0_3] : memref<8x128xi32, #tpu.memory_space<vmem>>, vector<8x128xi32>
    %c0_4 = arith.constant 0 : index
    %c0_5 = arith.constant 0 : index
    %2 = vector.load %arg3[%c0_4, %c0_5] : memref<8x128xf32, #tpu.memory_space<vmem>>, vector<8x128xf32>
    %cst = arith.constant dense<0xFF800000> : vector<8x128xf32>
    %3 = vector.multi_reduction <maximumf>, %0, %cst [0] : vector<10x8x128xf32> to vector<8x128xf32>
    %cst_6 = arith.constant 0.000000e+00 : f32
    %4 = vector.broadcast %cst_6 : f32 to vector<8x128xf32>
    %cst_7 = arith.constant 0.000000e+00 : f32
    %5 = vector.broadcast %cst_7 : f32 to vector<8x128xf32>
    %cst_8 = arith.constant 0.000000e+00 : f32
    %6 = vector.broadcast %cst_8 : f32 to vector<8x128xf32>
    %7 = vector.extract_strided_slice %0 {offsets = [0, 0, 0], sizes = [1, 8, 128], strides = [1, 1, 1]} : vector<10x8x128xf32> to vector<1x8x128xf32>
    %8 = vector.shape_cast %7 : vector<1x8x128xf32> to vector<8x128xf32>
    %9 = arith.subf %8, %3 : vector<8x128xf32>
    %10 = math.exp %9 : vector<8x128xf32>
    %11 = arith.addf %4, %10 : vector<8x128xf32>
    %c0_i32 = arith.constant 0 : i32
    %12 = vector.broadcast %c0_i32 : i32 to vector<8x128xi32>
    %13 = arith.cmpi eq, %1, %12 : vector<8x128xi32>
    %14 = vector.extract_strided_slice %0 {offsets = [0, 0, 0], sizes = [1, 8, 128], strides = [1, 1, 1]} : vector<10x8x128xf32> to vector<1x8x128xf32>
    %15 = vector.shape_cast %14 : vector<1x8x128xf32> to vector<8x128xf32>
    %16 = arith.select %13, %15, %5 : vector<8x128xi1>, vector<8x128xf32>
    %17 = arith.select %13, %10, %6 : vector<8x128xi1>, vector<8x128xf32>
    %18 = vector.extract_strided_slice %0 {offsets = [1, 0, 0], sizes = [1, 8, 128], strides = [1, 1, 1]} : vector<10x8x128xf32> to vector<1x8x128xf32>
    %19 = vector.shape_cast %18 : vector<1x8x128xf32> to vector<8x128xf32>
    %20 = arith.subf %19, %3 : vector<8x128xf32>
    %21 = math.exp %20 : vector<8x128xf32>
    %22 = arith.addf %11, %21 : vector<8x128xf32>
    %c1_i32 = arith.constant 1 : i32
    %23 = vector.broadcast %c1_i32 : i32 to vector<8x128xi32>
    %24 = arith.cmpi eq, %1, %23 : vector<8x128xi32>
    %25 = vector.extract_strided_slice %0 {offsets = [1, 0, 0], sizes = [1, 8, 128], strides = [1, 1, 1]} : vector<10x8x128xf32> to vector<1x8x128xf32>
    %26 = vector.shape_cast %25 : vector<1x8x128xf32> to vector<8x128xf32>
    %27 = arith.select %24, %26, %16 : vector<8x128xi1>, vector<8x128xf32>
    %28 = arith.select %24, %21, %17 : vector<8x128xi1>, vector<8x128xf32>
    %29 = vector.extract_strided_slice %0 {offsets = [2, 0, 0], sizes = [1, 8, 128], strides = [1, 1, 1]} : vector<10x8x128xf32> to vector<1x8x128xf32>
    %30 = vector.shape_cast %29 : vector<1x8x128xf32> to vector<8x128xf32>
    %31 = arith.subf %30, %3 : vector<8x128xf32>
    %32 = math.exp %31 : vector<8x128xf32>
    %33 = arith.addf %22, %32 : vector<8x128xf32>
    %c2_i32 = arith.constant 2 : i32
    %34 = vector.broadcast %c2_i32 : i32 to vector<8x128xi32>
    %35 = arith.cmpi eq, %1, %34 : vector<8x128xi32>
    %36 = vector.extract_strided_slice %0 {offsets = [2, 0, 0], sizes = [1, 8, 128], strides = [1, 1, 1]} : vector<10x8x128xf32> to vector<1x8x128xf32>
    %37 = vector.shape_cast %36 : vector<1x8x128xf32> to vector<8x128xf32>
    %38 = arith.select %35, %37, %27 : vector<8x128xi1>, vector<8x128xf32>
    %39 = arith.select %35, %32, %28 : vector<8x128xi1>, vector<8x128xf32>
    %40 = vector.extract_strided_slice %0 {offsets = [3, 0, 0], sizes = [1, 8, 128], strides = [1, 1, 1]} : vector<10x8x128xf32> to vector<1x8x128xf32>
    %41 = vector.shape_cast %40 : vector<1x8x128xf32> to vector<8x128xf32>
    %42 = arith.subf %41, %3 : vector<8x128xf32>
    %43 = math.exp %42 : vector<8x128xf32>
    %44 = arith.addf %33, %43 : vector<8x128xf32>
    %c3_i32 = arith.constant 3 : i32
    %45 = vector.broadcast %c3_i32 : i32 to vector<8x128xi32>
    %46 = arith.cmpi eq, %1, %45 : vector<8x128xi32>
    %47 = vector.extract_strided_slice %0 {offsets = [3, 0, 0], sizes = [1, 8, 128], strides = [1, 1, 1]} : vector<10x8x128xf32> to vector<1x8x128xf32>
    %48 = vector.shape_cast %47 : vector<1x8x128xf32> to vector<8x128xf32>
    %49 = arith.select %46, %48, %38 : vector<8x128xi1>, vector<8x128xf32>
    %50 = arith.select %46, %43, %39 : vector<8x128xi1>, vector<8x128xf32>
    %51 = vector.extract_strided_slice %0 {offsets = [4, 0, 0], sizes = [1, 8, 128], strides = [1, 1, 1]} : vector<10x8x128xf32> to vector<1x8x128xf32>
    %52 = vector.shape_cast %51 : vector<1x8x128xf32> to vector<8x128xf32>
    %53 = arith.subf %52, %3 : vector<8x128xf32>
    %54 = math.exp %53 : vector<8x128xf32>
    %55 = arith.addf %44, %54 : vector<8x128xf32>
    %c4_i32 = arith.constant 4 : i32
    %56 = vector.broadcast %c4_i32 : i32 to vector<8x128xi32>
    %57 = arith.cmpi eq, %1, %56 : vector<8x128xi32>
    %58 = vector.extract_strided_slice %0 {offsets = [4, 0, 0], sizes = [1, 8, 128], strides = [1, 1, 1]} : vector<10x8x128xf32> to vector<1x8x128xf32>
    %59 = vector.shape_cast %58 : vector<1x8x128xf32> to vector<8x128xf32>
    %60 = arith.select %57, %59, %49 : vector<8x128xi1>, vector<8x128xf32>
    %61 = arith.select %57, %54, %50 : vector<8x128xi1>, vector<8x128xf32>
    %62 = vector.extract_strided_slice %0 {offsets = [5, 0, 0], sizes = [1, 8, 128], strides = [1, 1, 1]} : vector<10x8x128xf32> to vector<1x8x128xf32>
    %63 = vector.shape_cast %62 : vector<1x8x128xf32> to vector<8x128xf32>
    %64 = arith.subf %63, %3 : vector<8x128xf32>
    %65 = math.exp %64 : vector<8x128xf32>
    %66 = arith.addf %55, %65 : vector<8x128xf32>
    %c5_i32 = arith.constant 5 : i32
    %67 = vector.broadcast %c5_i32 : i32 to vector<8x128xi32>
    %68 = arith.cmpi eq, %1, %67 : vector<8x128xi32>
    %69 = vector.extract_strided_slice %0 {offsets = [5, 0, 0], sizes = [1, 8, 128], strides = [1, 1, 1]} : vector<10x8x128xf32> to vector<1x8x128xf32>
    %70 = vector.shape_cast %69 : vector<1x8x128xf32> to vector<8x128xf32>
    %71 = arith.select %68, %70, %60 : vector<8x128xi1>, vector<8x128xf32>
    %72 = arith.select %68, %65, %61 : vector<8x128xi1>, vector<8x128xf32>
    %73 = vector.extract_strided_slice %0 {offsets = [6, 0, 0], sizes = [1, 8, 128], strides = [1, 1, 1]} : vector<10x8x128xf32> to vector<1x8x128xf32>
    %74 = vector.shape_cast %73 : vector<1x8x128xf32> to vector<8x128xf32>
    %75 = arith.subf %74, %3 : vector<8x128xf32>
    %76 = math.exp %75 : vector<8x128xf32>
    %77 = arith.addf %66, %76 : vector<8x128xf32>
    %c6_i32 = arith.constant 6 : i32
    %78 = vector.broadcast %c6_i32 : i32 to vector<8x128xi32>
    %79 = arith.cmpi eq, %1, %78 : vector<8x128xi32>
    %80 = vector.extract_strided_slice %0 {offsets = [6, 0, 0], sizes = [1, 8, 128], strides = [1, 1, 1]} : vector<10x8x128xf32> to vector<1x8x128xf32>
    %81 = vector.shape_cast %80 : vector<1x8x128xf32> to vector<8x128xf32>
    %82 = arith.select %79, %81, %71 : vector<8x128xi1>, vector<8x128xf32>
    %83 = arith.select %79, %76, %72 : vector<8x128xi1>, vector<8x128xf32>
    %84 = vector.extract_strided_slice %0 {offsets = [7, 0, 0], sizes = [1, 8, 128], strides = [1, 1, 1]} : vector<10x8x128xf32> to vector<1x8x128xf32>
    %85 = vector.shape_cast %84 : vector<1x8x128xf32> to vector<8x128xf32>
    %86 = arith.subf %85, %3 : vector<8x128xf32>
    %87 = math.exp %86 : vector<8x128xf32>
    %88 = arith.addf %77, %87 : vector<8x128xf32>
    %c7_i32 = arith.constant 7 : i32
    %89 = vector.broadcast %c7_i32 : i32 to vector<8x128xi32>
    %90 = arith.cmpi eq, %1, %89 : vector<8x128xi32>
    %91 = vector.extract_strided_slice %0 {offsets = [7, 0, 0], sizes = [1, 8, 128], strides = [1, 1, 1]} : vector<10x8x128xf32> to vector<1x8x128xf32>
    %92 = vector.shape_cast %91 : vector<1x8x128xf32> to vector<8x128xf32>
    %93 = arith.select %90, %92, %82 : vector<8x128xi1>, vector<8x128xf32>
    %94 = arith.select %90, %87, %83 : vector<8x128xi1>, vector<8x128xf32>
    %95 = vector.extract_strided_slice %0 {offsets = [8, 0, 0], sizes = [1, 8, 128], strides = [1, 1, 1]} : vector<10x8x128xf32> to vector<1x8x128xf32>
    %96 = vector.shape_cast %95 : vector<1x8x128xf32> to vector<8x128xf32>
    %97 = arith.subf %96, %3 : vector<8x128xf32>
    %98 = math.exp %97 : vector<8x128xf32>
    %99 = arith.addf %88, %98 : vector<8x128xf32>
    %c8_i32 = arith.constant 8 : i32
    %100 = vector.broadcast %c8_i32 : i32 to vector<8x128xi32>
    %101 = arith.cmpi eq, %1, %100 : vector<8x128xi32>
    %102 = vector.extract_strided_slice %0 {offsets = [8, 0, 0], sizes = [1, 8, 128], strides = [1, 1, 1]} : vector<10x8x128xf32> to vector<1x8x128xf32>
    %103 = vector.shape_cast %102 : vector<1x8x128xf32> to vector<8x128xf32>
    %104 = arith.select %101, %103, %93 : vector<8x128xi1>, vector<8x128xf32>
    %105 = arith.select %101, %98, %94 : vector<8x128xi1>, vector<8x128xf32>
    %106 = vector.extract_strided_slice %0 {offsets = [9, 0, 0], sizes = [1, 8, 128], strides = [1, 1, 1]} : vector<10x8x128xf32> to vector<1x8x128xf32>
    %107 = vector.shape_cast %106 : vector<1x8x128xf32> to vector<8x128xf32>
    %108 = arith.subf %107, %3 : vector<8x128xf32>
    %109 = math.exp %108 : vector<8x128xf32>
    %110 = arith.addf %99, %109 : vector<8x128xf32>
    %c9_i32 = arith.constant 9 : i32
    %111 = vector.broadcast %c9_i32 : i32 to vector<8x128xi32>
    %112 = arith.cmpi eq, %1, %111 : vector<8x128xi32>
    %113 = vector.extract_strided_slice %0 {offsets = [9, 0, 0], sizes = [1, 8, 128], strides = [1, 1, 1]} : vector<10x8x128xf32> to vector<1x8x128xf32>
    %114 = vector.shape_cast %113 : vector<1x8x128xf32> to vector<8x128xf32>
    %115 = arith.select %112, %114, %104 : vector<8x128xi1>, vector<8x128xf32>
    %116 = arith.select %112, %109, %105 : vector<8x128xi1>, vector<8x128xf32>
    %117 = math.log %110 : vector<8x128xf32>
    %118 = arith.addf %117, %3 : vector<8x128xf32>
    %119 = arith.subf %118, %115 : vector<8x128xf32>
    %120 = arith.divf %116, %110 : vector<8x128xf32>
    %cst_9 = arith.constant 1.000000e+00 : f32
    %121 = vector.broadcast %cst_9 : f32 to vector<8x128xf32>
    %122 = arith.subf %121, %120 : vector<8x128xf32>
    %cst_10 = arith.constant 2.000000e+00 : f32
    %123 = vector.broadcast %cst_10 : f32 to vector<8x128xf32>
    %124 = arith.mulf %123, %122 : vector<8x128xf32>
    %125 = arith.mulf %124, %2 : vector<8x128xf32>
    %cst_11 = arith.constant 1.000000e-03 : f32
    %126 = vector.broadcast %cst_11 : f32 to vector<8x128xf32>
    %127 = arith.addf %125, %126 : vector<8x128xf32>
    %cst_12 = arith.constant 1.000000e+04 : f32
    %128 = vector.broadcast %cst_12 : f32 to vector<8x128xf32>
    %129 = arith.divf %128, %127 : vector<8x128xf32>
    %130 = arith.mulf %119, %129 : vector<8x128xf32>
    %c1_i32_13 = arith.constant 1 : i32
    %131 = arith.addi %arg0, %c1_i32_13 : i32
    %c128_i32 = arith.constant 128 : i32
    %132 = arith.muli %131, %c128_i32 : i32
    %c896_i32 = arith.constant 896 : i32
    %133 = arith.addi %c896_i32, %132 : i32
    %c8_i32_14 = arith.constant 8 : i32
    %134 = arith.cmpi sgt, %133, %c8_i32_14 : i32
    %135 = arith.extui %134 : i1 to i32
    %c0_i32_15 = arith.constant 0 : i32
    %136 = arith.cmpi ne, %135, %c0_i32_15 : i32
    scf.if %136 {
      %140 = tpu.iota {dimensions = array<i32: 0>} : vector<8x128xi32>
      %141 = tpu.iota {dimensions = array<i32: 1>} : vector<8x128xi32>
      %c128_i32_17 = arith.constant 128 : i32
      %142 = arith.muli %arg0, %c128_i32_17 : i32
      %143 = vector.broadcast %142 : i32 to vector<8x128xi32>
      %144 = arith.addi %141, %143 : vector<8x128xi32>
      %c128_i32_18 = arith.constant 128 : i32
      %145 = vector.broadcast %c128_i32_18 : i32 to vector<8x128xi32>
      %146 = arith.muli %140, %145 : vector<8x128xi32>
      %147 = arith.addi %146, %144 : vector<8x128xi32>
      %c8_i32_19 = arith.constant 8 : i32
      %148 = vector.broadcast %c8_i32_19 : i32 to vector<8x128xi32>
      %149 = arith.cmpi slt, %147, %148 : vector<8x128xi32>
      %cst_20 = arith.constant 0.000000e+00 : f32
      %150 = vector.broadcast %cst_20 : f32 to vector<8x128xf32>
      %151 = arith.select %149, %130, %150 : vector<8x128xi1>, vector<8x128xf32>
      %cst_21 = arith.constant dense<0.000000e+00> : vector<8xf32>
      %152 = vector.multi_reduction <add>, %151, %cst_21 [1] : vector<8x128xf32> to vector<8xf32>
      %153 = vector.shape_cast %152 : vector<8xf32> to vector<8x1xf32>
      %cst_22 = arith.constant dense<0.000000e+00> : vector<1xf32>
      %154 = vector.multi_reduction <add>, %153, %cst_22 [0] : vector<8x1xf32> to vector<1xf32>
      %155 = vector.shape_cast %154 : vector<1xf32> to vector<1x1xf32>
      %156 = vector.shape_cast %155 : vector<1x1xf32> to vector<1x1x1xf32>
      %c0_23 = arith.constant 0 : index
      %c0_24 = arith.constant 0 : index
      %c0_25 = arith.constant 0 : index
      %157 = vector.load %arg4[%c0_23, %c0_24, %c0_25] : memref<1x1x1xf32, #tpu.memory_space<vmem>>, vector<1x1x1xf32>
      tpu.vector_store %arg4[%c0_23, %c0_24, %c0_25], %156 {strides = array<i32>} : memref<1x1x1xf32, #tpu.memory_space<vmem>>, vector<1x1x1xf32>,
    } else {
    }
    %true = arith.constant true
    %137 = arith.xori %134, %true : i1
    %138 = arith.extui %137 : i1 to i32
    %c0_i32_16 = arith.constant 0 : i32
    %139 = arith.cmpi ne, %138, %c0_i32_16 : i32
    scf.if %139 {
      %cst_17 = arith.constant dense<0.000000e+00> : vector<8xf32>
      %140 = vector.multi_reduction <add>, %130, %cst_17 [1] : vector<8x128xf32> to vector<8xf32>
      %141 = vector.shape_cast %140 : vector<8xf32> to vector<8x1xf32>
      %cst_18 = arith.constant dense<0.000000e+00> : vector<1xf32>
      %142 = vector.multi_reduction <add>, %141, %cst_18 [0] : vector<8x1xf32> to vector<1xf32>
      %143 = vector.shape_cast %142 : vector<1xf32> to vector<1x1xf32>
      %144 = vector.shape_cast %143 : vector<1x1xf32> to vector<1x1x1xf32>
      %c0_19 = arith.constant 0 : index
      %c0_20 = arith.constant 0 : index
      %c0_21 = arith.constant 0 : index
      %145 = vector.load %arg4[%c0_19, %c0_20, %c0_21] : memref<1x1x1xf32, #tpu.memory_space<vmem>>, vector<1x1x1xf32>
      tpu.vector_store %arg4[%c0_19, %c0_20, %c0_21], %144 {strides = array<i32>} : memref<1x1x1xf32, #tpu.memory_space<vmem>>, vector<1x1x1xf32>,
    } else {
    }
    return
  }
  func.func @transform_0(%arg0: i32) -> (i32, i32, i32) {
    %c0_i32 = arith.constant 0 : i32
    %c0_i32_0 = arith.constant 0 : i32
    %c0_i32_1 = arith.constant 0 : i32
    return %c0_i32, %c0_i32_0, %arg0 : i32, i32, i32
  }
  func.func @transform_1(%arg0: i32) -> (i32, i32) {
    %c0_i32 = arith.constant 0 : i32
    %c0_i32_0 = arith.constant 0 : i32
    return %c0_i32, %arg0 : i32, i32
  }
  func.func @transform_2(%arg0: i32) -> (i32, i32) {
    %c0_i32 = arith.constant 0 : i32
    %c0_i32_0 = arith.constant 0 : i32
    return %c0_i32, %arg0 : i32, i32
  }
  func.func @transform_3(%arg0: i32) -> (i32, i32, i32) {
    %c0_i32 = arith.constant 0 : i32
    %c0_i32_0 = arith.constant 0 : i32
    %c0_i32_1 = arith.constant 0 : i32
    return %arg0, %c0_i32, %c0_i32_0 : i32, i32, i32
  }
}

</mosaic_0001>

<bundles_post_ra>
// kernel: ib_loss_pallas.1
= control target key start
LH: loop header
LB: loop body
LE: loop exit
PB: predicated region body
PF: predicated region fallthrough
CT: control target
= control target key end

     0   :  { %s352_s0 = inlined_call_operand.vmem [shape: f32[10,8,128], index: 0, kind: input, shape index: {}]   ;;  %s353_s1 = inlined_call_operand.vmem [shape: s32[8,128], index: 1, kind: input, shape index: {}]   ;;  %s354_s2 = inlined_call_operand.vmem [shape: f32[8,128], index: 2, kind: input, shape index: {}]   ;;  %s355_s3 = inlined_call_operand.hbm [shape: f32[1,1,1], index: 3, kind: output, shape index: {}]  }
   0x1   :  { %v15_v0 = vld [vmem:[%s352_s0] sm:$0xff]  ;;  %v16_v1 = vld [vmem:[%s352_s0 + $0x8] sm:$0xff]  ;;  %v17_v2 = vld [vmem:[%s352_s0 + $0x10] sm:$0xff] }
   0x2   :  { %v18_v3 = vld [vmem:[%s352_s0 + $0x18] sm:$0xff]  ;;  %v19_v4 = vld [vmem:[%s352_s0 + $0x20] sm:$0xff]  ;;  %v20_v5 = vld [vmem:[%s352_s0 + $0x28] sm:$0xff] }
   0x3   :  { %v21_v6 = vld [vmem:[%s352_s0 + $0x30] sm:$0xff]  ;;  %v22_v7 = vld [vmem:[%s352_s0 + $0x38] sm:$0xff]  ;;  %v23_v8 = vld [vmem:[%s352_s0 + $0x40] sm:$0xff]  ;;  %v27_v9 = vmax.f32 %v15_v0, %v19_v4  ;;  %v28_v10 = vmax.f32 %v16_v1, %v20_v5 }
   0x4   :  { %v24_v11 = vld [vmem:[%s352_s0 + $0x48] sm:$0xff]  ;;  %v278_v12 = vld [vmem:[%s353_s1] sm:$0xff]  ;;  %v29_v13 = vmax.f32 %v17_v2, %v21_v6  ;;  %v30_v14 = vmax.f32 %v18_v3, %v22_v7 }
   0x5   :  { %v31_v15 = vmax.f32 %v27_v9, %v23_v8  ;;  %v32_v16 = vmax.f32 %v28_v10, %v24_v11  ;;  %vm40_vm0 = vcmp.eq.s32.totalorder %v278_v12, 0 }
   0x6   :  { %8 = vsyncpa [#allocation3], 0  ;;  %v34_v17 = vmax.f32 %v29_v13, %v30_v14  ;;  %v41_v18 = vsel %vm40_vm0, %v15_v0, 0.0  ;;  %vm47_vm1 = vcmp.eq.s32.totalorder %v278_v12, 1  ;;  %vm54_vm2 = vcmp.eq.s32.totalorder %v278_v12, 2 }
   0x7   :  { %v33_v19 = vmax.f32 %v31_v15, %v32_v16  ;;  %v48_v20 = vsel %vm47_vm1, %v16_v1, %v41_v18  ;;  %vm61_vm3 = vcmp.eq.s32.totalorder %v278_v12, 3  ;;  %vm68_vm4 = vcmp.eq.s32.totalorder %v278_v12, 4 }
   0x8   :  { %v55_v21 = vsel %vm54_vm2, %v17_v2, %v48_v20  ;;  %vm75_vm5 = vcmp.eq.s32.totalorder %v278_v12, 5  ;;  %vm82_vm6 = vcmp.eq.s32.totalorder %v278_v12, 6  ;;  %vm89_vm7 = vcmp.eq.s32.totalorder %v278_v12, 7 }
   0x9   :  { %v290_v22 = vmax.f32 %v33_v19, %v34_v17  ;;  %v62_v23 = vsel %vm61_vm3, %v18_v3, %v55_v21  ;;  %vm96_vm8 = vcmp.eq.s32.totalorder %v278_v12, 8  ;;  %vm103_vm9 = vcmp.eq.s32.totalorder %v278_v12, 9 }
   0xa   :  { %v69_v24 = vsel %vm68_vm4, %v19_v4, %v62_v23  ;;  %v26_v23 = vld [vmem:[%s354_s2] sm:$0xff]  ;;  %s224_s2 = smov [#allocation2]   ;;  %vm145_vm11 = vcmask 0  }
   0xb   :  { %v36_v25 = vsub.f32 %v15_v0, %v290_v22  ;;  %v43_v26 = vsub.f32 %v16_v1, %v290_v22  ;;  %v50_v27 = vsub.f32 %v17_v2, %v290_v22  ;;  %v57_v28 = vsub.f32 %v18_v3, %v290_v22  ;;  %s167_s7 = sshll.u32 %s224_s2, 4  ;;  %s168_s7 = int_to_ptr.vmem [resolvable:$true] %s167_s7 }
   0xc   :  { %v64_v29 = vsub.f32 %v19_v4, %v290_v22  ;;  %v76_v30 = vsel %vm75_vm5, %v20_v5, %v69_v24  ;;  %v71_v36 = vsub.f32 %v20_v5, %v290_v22  ;;  %v78_v39 = vsub.f32 %v21_v6, %v290_v22  ;;  %s202_s8 = scalar_lea.vmem %s168_s7, 16  ;;  %s206_s9 = scalar_lea.vmem %s168_s7, 32 }
   0xd   :  { %v37_v31 = vmul.f32 1.442695, %v36_v25  ;;  %v44_v32 = vmul.f32 1.442695, %v43_v26  ;;  %v51_v33 = vmul.f32 1.442695, %v50_v27  ;;  %v83_v34 = vsel %vm82_vm6, %v21_v6, %v76_v30  ;;  %p203_p0 = scmp.ne.s32.totalorder %s168_s7, %s202_s8  ;;  %p207_p1 = scmp.lt.s32.totalorder %s168_s7, %s168_s7 }
   0xe   :  { %v58_v35 = vmul.f32 1.442695, %v57_v28  ;;  %v90_v37 = vsel %vm89_vm7, %v22_v7, %v83_v34  ;;  %v65_v38 = vmul.f32 1.442695, %v64_v29  ;;  %v72_v42 = vmul.f32 1.442695, %v71_v36  ;;  %p208_p2 = scmp.lt.s32.totalorder %s206_s9, %s202_s8 }
   0xf   :  { %176 = vpow2.f32 %v37_v31  ;;  %v97_v40 = vsel %vm96_vm8, %v23_v8, %v90_v37  ;;  %v85_v43 = vsub.f32 %v22_v7, %v290_v22  ;;  %v79_v44 = vmul.f32 1.442695, %v78_v39 }
  0x10   :  { %178 = vpow2.f32 %v44_v32  ;;  %v319_v41 = vsel %vm103_vm9, %v24_v11, %v97_v40  ;;  %v92_v45 = vsub.f32 %v23_v8, %v290_v22  ;;  %v99_v47 = vsub.f32 %v24_v11, %v290_v22  ;;  %p209_p3 = por %p208_p2, %p207_p1 }
  0x11   :  { %180 = vpow2.f32 %v51_v33  ;;  %v86_v46 = vmul.f32 1.442695, %v85_v43  ;;  %v126_v28 = vlaneseq }
  0x12   :  { %182 = vpow2.f32 %v58_v35  ;;  %v93_v48 = vmul.f32 1.442695, %v92_v45  ;;  %v100_v49 = vmul.f32 1.442695, %v99_v47  ;;  %p210_p4 = pnand %p209_p3, %p203_p0 }
  0x13   :  { %184 = vpow2.f32 %v65_v38  ;;  %v127_v12 = vshrl.u32 %v126_v28, 7  ;;  %v129_v29 = vand.u32 127, %v126_v28 }
  0x14   :  { %186 = vpow2.f32 %v72_v42 }
  0x15   :  { %188 = vpow2.f32 %v79_v44  ;;  %v133_v30 = vmul.u32 128, %v127_v12 }
  0x16   :  { %190 = vpow2.f32 %v86_v46 }
  0x17   :  { %192 = vpow2.f32 %v93_v48  ;;  %v134_v31 = vadd.s32 %v133_v30, %v129_v29 }
  0x18   :  { %194 = vpow2.f32 %v100_v49 }
  0x19   :  { %vm135_vm10 = vcmp.lt.s32.totalorder %v134_v31, 8 }
  0x1c   :  { %v177_v50 = vpop.eup %176 }
  0x1d   :  { %v179_v51 = vpop.eup %178  ;;  %v42_v57 = vsel %vm40_vm0, %v177_v50, 0.0 }
  0x1e   :  { %v181_v52 = vpop.eup %180  ;;  %v46_v53 = vadd.f32 %v179_v51, %v177_v50  ;;  %v49_v60 = vsel %vm47_vm1, %v179_v51, %v42_v57 }
  0x1f   :  { %v183_v54 = vpop.eup %182  ;;  %v56_v1 = vsel %vm54_vm2, %v181_v52, %v49_v60 }
  0x20   :  { %v53_v55 = vadd.f32 %v181_v52, %v46_v53  ;;  %v185_v56 = vpop.eup %184  ;;  %v63_v4 = vsel %vm61_vm3, %v183_v54, %v56_v1 }
  0x21   :  { %v187_v59 = vpop.eup %186  ;;  %v70_v8 = vsel %vm68_vm4, %v185_v56, %v63_v4 }
  0x22   :  { %v60_v58 = vadd.f32 %v183_v54, %v53_v55  ;;  %v189_v62 = vpop.eup %188  ;;  %v77_v10 = vsel %vm75_vm5, %v187_v59, %v70_v8 }
  0x23   :  { %v191_v0 = vpop.eup %190  ;;  %v84_v11 = vsel %vm82_vm6, %v189_v62, %v77_v10 }
  0x24   :  { %v67_v61 = vadd.f32 %v185_v56, %v60_v58  ;;  %v193_v3 = vpop.eup %192  ;;  %v91_v13 = vsel %vm89_vm7, %v191_v0, %v84_v11 }
  0x25   :  { %v195_v6 = vpop.eup %194  ;;  %v98_v14 = vsel %vm96_vm8, %v193_v3, %v91_v13 }
  0x26   :  { %v74_v63 = vadd.f32 %v187_v59, %v67_v61  ;;  %v105_v15 = vsel %vm103_vm9, %v195_v6, %v98_v14 }
  0x28   :  { %v81_v2 = vadd.f32 %v189_v62, %v74_v63 }
  0x2a   :  { %v88_v5 = vadd.f32 %v191_v0, %v81_v2 }
  0x2c   :  { %v95_v7 = vadd.f32 %v193_v3, %v88_v5 }
  0x2e   :  { %v102_v9 = vadd.f32 %v195_v6, %v95_v7 }
  0x30   :  { %196 = vlog2.f32 %v102_v9 }
  0x31   :  { %198 = vrcp.f32 %v102_v9 }
  0x3d   :  { %v197_v16 = vpop.eup %196 }
  0x3e   :  { %v199_v17 = vpop.eup %198  ;;  %v107_v18 = vmul.f32 0.6931472, %v197_v16 }
  0x3f   :  { %v111_v19 = vmul.f32 %v199_v17, %v105_v15 }
  0x40   :  { %v108_v20 = vadd.f32 %v107_v18, %v290_v22 }
  0x41   :  { %v112_v21 = vsub.f32 1.0, %v111_v19 }
  0x42   :  { %v109_v24 = vsub.f32 %v108_v20, %v319_v41 }
  0x43   :  { %v113_v25 = vmul.f32 2.0, %v112_v21 }
  0x45   :  { %v114_v26 = vmul.f32 %v113_v25, %v26_v23 }
  0x47   :  { %v115_v27 = vadd.f32 0.001, %v114_v26 }
  0x49   :  { %200 = vrcp.f32 %v115_v27 }
  0x56   :  { %v201_v32 = vpop.eup %200 }
  0x57   :  { %v117_v33 = vmul.f32 10000.0, %v201_v32 }
  0x59   :  { %v118_v22 = vmul.f32 %v117_v33, %v109_v24 }
  0x5b   :  { %v136_v34 = vsel %vm135_vm10, %v118_v22, 0.0 }
  0x5c   :  { %137 = vadd.xlane.f32.xlu0 %v136_v34 }
  0xe5   :  { %v138_v35 = vpop.xlane.xlu0 %137 }
  0xe6   :  { %v139_v36 = vrot.slane %v138_v35, 4 }
  0xe8   :  { %v140_v37 = vadd.f32 %v139_v36, %v138_v35 }
  0xea   :  { %v141_v38 = vrot.slane %v140_v37, 2 }
  0xec   :  { %v142_v39 = vadd.f32 %v141_v38, %v140_v37 }
  0xee   :  { %v143_v40 = vrot.slane %v142_v39, 1 }
  0xf0   :  { %v144_v41 = vadd.f32 %v143_v40, %v142_v39 }
  0xf2   :  { %146 = vst.msk [vmem:[#allocation2] sm:$0x1] %vm145_vm11, %v144_v41 }
  0xf3   :  { %213 = shalt.err (!%p210_p4)
}
  0xf4   :  { %170 = dma.vmem_to_hbm [thread:$0]  %s168_s7, 16, %s355_s3, [#allocation3]  }
  0xf5   :  { %222 = dma.done.wait [#allocation3], 16  }
  0xf6   :  { %223 = vsyncadd [#allocation3], 4294967280 }
  0xf7   :  { %174 = vsyncpa [#allocation3], 1 }

</bundles_post_ra>
